<compile_context>
chip_gen: v5e
topology: v5e:2x2
jax: 0.10.0
libtpu: 0.0.40
codegen_flags: <defaults>
</compile_context>

<pallas_src>
import functools
import math

import jax
import jax.numpy as jnp
from jax.experimental import pallas as pl
from jax.experimental.pallas import tpu as pltpu


def _rcos_kernel(siq_ref, sikv_ref, salkv_ref, res_ref, o_ref, acc_ref, q_ref,
                 *, inv_scale, softmax_dtype, nj):
    """One (batch, query-tile, key-tile) step of the fused RCOS attention.

    Shapes (batch dim squeezed away):
      siq_ref / res_ref / o_ref : [H, Li, D]
      sikv_ref / salkv_ref      : [H, Lj, D]
      acc_ref (f32) / q_ref (input dtype): [H, Li, D]
    j < nj  : block 1 (keys/values = si), accumulate x_self into acc_ref.
    j == nj : acc_ref -> scaled block-2 query (x_self), reset accumulator.
    j >= nj : block 2 (keys/values = sal), accumulate output into acc_ref.
    """
    j = pl.program_id(2)

    @pl.when(j == 0)
    def _():
        # Hoisted query scaling: done once per (b, i) tile, not per key tile.
        acc_ref[...] = jnp.zeros_like(acc_ref)
        q_ref[...] = (siq_ref[...] * inv_scale).astype(q_ref.dtype)

    def attend(kv):
        # kv: [H, Lj, D] in the input dtype.  QK^T accumulates in f32 on the
        # MXU; softmax math runs in `softmax_dtype`; value matmul goes back to
        # the input dtype with an f32 accumulator.
        e = jnp.einsum("hid,hjd->hij", q_ref[...], kv,
                       preferred_element_type=jnp.float32).astype(softmax_dtype)
        # softmax over the head axis (== torch.softmax(..., dim=1)); every
        # (i, j) position is normalized independently, so each key tile is
        # self-contained.
        m = jnp.max(e, axis=0, keepdims=True)
        p = jnp.exp(e - m)
        den = jnp.sum(p, axis=0, keepdims=True)
        inv = pl.reciprocal(den.astype(jnp.float32), approx=True)  # EUP slot
        a = p * inv.astype(softmax_dtype)
        acc_ref[...] += jnp.einsum("hij,hjd->hid", a.astype(kv.dtype), kv,
                                   preferred_element_type=jnp.float32)

    @pl.when(j < nj)
    def _():
        attend(sikv_ref[...])            # block 1: keys/values = si

    @pl.when(j == nj)
    def _():
        # acc_ref now holds x_self for this (b, i) tile; it becomes block 2's
        # (pre-scaled) query.  Reuse the accumulator for block 2's output.
        q_ref[...] = (acc_ref[...] * inv_scale).astype(q_ref.dtype)
        acc_ref[...] = jnp.zeros_like(acc_ref)

    @pl.when(j >= nj)
    def _():
        attend(salkv_ref[...])           # block 2: keys/values = sal

    @pl.when(j == 2 * nj - 1)
    def _():
        o_ref[...] = (acc_ref[...]
                      + res_ref[...].astype(jnp.float32)).astype(o_ref.dtype)


def _device_kind():
    try:
        return jax.devices()[0].device_kind.lower()
    except Exception:
        return ""


def _pick_block(length, desired, preferred_multiple):
    """Largest tile <= desired dividing `length`, preferring multiples of
    `preferred_multiple` (lane/sublane alignment), then multiples of 8;
    falls back to the full length (always legal)."""
    if length <= desired:
        return length
    best_pref = best_8 = None
    for cand in range(min(desired, length), 0, -1):
        if length % cand:
            continue
        if cand % preferred_multiple == 0:
            best_pref = cand
            break
        if best_8 is None and cand % 8 == 0:
            best_8 = cand
    if best_pref is not None:
        return best_pref
    if best_8 is not None:
        return best_8
    return length


def rcos_forward(sal, si, num_in=128, *, block_q=256, block_kv=256):
    """RCOS forward (eval mode).  sal, si: [B, H, L, D] with the same dtype."""
    B, H, L, D = sal.shape
    assert si.shape == (B, H, L, D) and si.dtype == sal.dtype
    dtype = sal.dtype
    itemsize = jnp.dtype(dtype).itemsize
    inv_scale = 1.0 / math.sqrt(float(num_in))

    kind = _device_kind()
    is_v7 = ("v7" in kind) or ("7x" in kind)
    has_bf16_vpu = ("v6" in kind) or is_v7          # v5e/v5p: no bf16 VPU/EUP
    softmax_dtype = dtype if (dtype == jnp.bfloat16 and has_bf16_vpu) else jnp.float32
    sm_bytes = jnp.dtype(softmax_dtype).itemsize

    sub_mult = 16 if itemsize == 2 else 8           # bf16 sublane packing
    Li = _pick_block(L, block_q, sub_mult)
    Lj = _pick_block(L, block_kv, 128)              # Lj = lane dim of the energy

    # v7x has two TensorCores: keep the parallel grid extent B * (L/Li) >= 2.
    if is_v7 and B * (L // Li) < 2 and L >= 2 * sub_mult:
        Li = _pick_block(L, Li // 2, sub_mult)

    vmem_physical = (64 if is_v7 else 128) << 20
    vmem_cap = int(vmem_physical * 0.8)

    def vmem_estimate(li, lj):
        q_tile = H * li * D * itemsize              # query / residual / output tile
        kv_tile = H * lj * D * itemsize             # si / sal key-value tile
        pipelined = 2 * (2 * q_tile) + 2 * (2 * kv_tile) + 2 * q_tile
        scratch = H * li * D * (4 + itemsize)       # f32 acc + scaled query
        temps = H * li * lj * (4 + 2 * sm_bytes)    # f32 energy + live softmax temps
        return pipelined + scratch + temps

    def shrink(cur, mult):
        new = _pick_block(L, cur // 2, mult)
        return new if new < cur else None

    # Over budget -> shrink the key tile first (it owns the big [H,Li,Lj]
    # temporaries), then the query tile.
    while vmem_estimate(Li, Lj) > vmem_cap:
        new_lj = shrink(Lj, 128) if Lj > 8 else None
        new_li = shrink(Li, sub_mult) if Li > 8 else None
        if new_lj is not None:
            Lj = new_lj
        elif new_li is not None:
            Li = new_li
        else:
            break

    nj = L // Lj
    grid = (B, L // Li, 2 * nj)
    vmem_limit = min(vmem_cap,
                     max(32 << 20, int(vmem_estimate(Li, Lj) * 1.5) + (4 << 20)))

    # q / residual / output blocks are j-invariant; Pallas skips their re-DMA
    # across the inner axis (their double-buffer cost is in the budget above).
    q_spec = pl.BlockSpec((pl.Squeezed(), H, Li, D), lambda b, i, j: (b, 0, i, 0))
    res_spec = pl.BlockSpec((pl.Squeezed(), H, Li, D), lambda b, i, j: (b, 0, i, 0))
    out_spec = pl.BlockSpec((pl.Squeezed(), H, Li, D), lambda b, i, j: (b, 0, i, 0))
    # Key/value tiles: si streams during the first half of j, sal during the
    # second half; the inactive one is clamped to its last index (no re-DMA).
    si_kv_spec = pl.BlockSpec(
        (pl.Squeezed(), H, Lj, D),
        lambda b, i, j: (b, 0, jnp.minimum(j, nj - 1), 0))
    sal_kv_spec = pl.BlockSpec(
        (pl.Squeezed(), H, Lj, D),
        lambda b, i, j: (b, 0, jnp.maximum(j - nj, 0), 0))

    kernel = functools.partial(_rcos_kernel, inv_scale=inv_scale,
                               softmax_dtype=softmax_dtype, nj=nj)

    return pl.pallas_call(
        kernel,
        out_shape=jax.ShapeDtypeStruct((B, H, L, D), dtype),
        grid_spec=pltpu.PrefetchScalarGridSpec(
            num_scalar_prefetch=0,
            grid=grid,
            in_specs=[q_spec, si_kv_spec, sal_kv_spec, res_spec],
            out_specs=out_spec,
            scratch_shapes=[pltpu.VMEM((H, Li, D), jnp.float32),   # accumulator
                            pltpu.VMEM((H, Li, D), dtype)],        # scaled query
        ),
        compiler_params=pltpu.CompilerParams(
            dimension_semantics=("parallel", "parallel", "arbitrary"),
            vmem_limit_bytes=vmem_limit,
        ),
    )(si, si, sal, sal)


def rcos_reference(sal, si, num_in):
    """Pure-JAX f32 reference mirroring the PyTorch module exactly."""
    sal = sal.astype(jnp.float32)
    si = si.astype(jnp.float32)
    scale = jnp.sqrt(jnp.float32(num_in))
    e_self = jnp.einsum("bhid,bhjd->bhij", si, si) / scale
    a_self = jax.nn.softmax(e_self, axis=1)          # softmax over heads (dim=1)
    x_self = jnp.einsum("bhij,bhjd->bhid", a_self, si)
    e = jnp.einsum("bhid,bhjd->bhij", x_self, sal) / scale
    a = jax.nn.softmax(e, axis=1)
    x = jnp.einsum("bhij,bhjd->bhid", a, sal)
    return sal + x


if __name__ == "__main__":
    # Small shapes consistent with the module (num_in default 128 => D=128,
    # which also keeps loads/stores lane-dense).
    B, H, L, D = 2, 4, 16, 128
    num_in = 128

    key = jax.random.PRNGKey(0)
    k_sal, k_si = jax.random.split(key)
    sal32 = jax.random.normal(k_sal, (B, H, L, D), dtype=jnp.float32)
    si32 = jax.random.normal(k_si, (B, H, L, D), dtype=jnp.float32)

    ref = jax.block_until_ready(rcos_reference(sal32, si32, num_in))

    # f32, default tiles (single key/query tile per block -> grid (2, 1, 2)).
    out_a = jax.block_until_ready(rcos_forward(sal32, si32, num_in))
    if not jnp.allclose(out_a, ref, atol=2e-2, rtol=2e-2):
        raise AssertionError("Pallas RCOS kernel (f32, default tiles) mismatch")

    # f32, small tiles: exercises query/key tiling and the in-kernel
    # block-1 -> block-2 handoff (grid (2, 2, 4)).
    out_b = jax.block_until_ready(
        rcos_forward(sal32, si32, num_in, block_q=8, block_kv=8))
    if not jnp.allclose(out_b, ref, atol=2e-2, rtol=2e-2):
        raise AssertionError("Pallas RCOS kernel (f32, tiled) mismatch")

    # bf16: MXU-native operands (bf16 softmax on v6e/v7x, f32 on older gens);
    # looser tolerance for bf16 rounding.
    sal16 = sal32.astype(jnp.bfloat16)
    si16 = si32.astype(jnp.bfloat16)
    out_c = jax.block_until_ready(
        rcos_forward(sal16, si16, num_in, block_q=8, block_kv=8))
    if not jnp.allclose(out_c.astype(jnp.float32), ref, atol=0.25, rtol=0.25):
        raise AssertionError("Pallas RCOS kernel (bf16) mismatch")

    print("KERNEL_OK")
</pallas_src>

<mosaic_0001>
module attributes {stable_mosaic.version = 11 : i64} {
  func.func @_rcos_kernel(%arg0: i32, %arg1: i32, %arg2: i32, %arg3: memref<1x4x16x128xf32, #tpu.memory_space<vmem>>, %arg4: memref<1x4x16x128xf32, #tpu.memory_space<vmem>>, %arg5: memref<1x4x16x128xf32, #tpu.memory_space<vmem>>, %arg6: memref<1x4x16x128xf32, #tpu.memory_space<vmem>>, %arg7: memref<1x4x16x128xf32, #tpu.memory_space<vmem>>, %arg8: memref<4x16x128xf32, #tpu.memory_space<vmem>>, %arg9: memref<4x16x128xf32, #tpu.memory_space<vmem>>) attributes {dimension_semantics = [#tpu.dimension_semantics<parallel>, #tpu.dimension_semantics<parallel>, #tpu.dimension_semantics<arbitrary>], iteration_bounds = array<i64: 2, 1, 2>, scalar_prefetch = 0 : i64, scratch_operands = 2 : i64, tpu.core_type = #tpu.core_type<tc>, window_params = [{transform_indices = @transform_0, window_bounds = array<i64: 1, 4, 16, 128>}, {transform_indices = @transform_1, window_bounds = array<i64: 1, 4, 16, 128>}, {transform_indices = @transform_2, window_bounds = array<i64: 1, 4, 16, 128>}, {transform_indices = @transform_3, window_bounds = array<i64: 1, 4, 16, 128>}, {transform_indices = @transform_4, window_bounds = array<i64: 1, 4, 16, 128>}]} {
    %c0_i32 = arith.constant 0 : i32
    %0 = arith.cmpi eq, %arg2, %c0_i32 : i32
    %1 = arith.extui %0 : i1 to i32
    %c0_i32_0 = arith.constant 0 : i32
    %2 = arith.cmpi ne, %1, %c0_i32_0 : i32
    scf.if %2 {
      %cst = arith.constant 0.000000e+00 : f32
      %15 = vector.broadcast %cst : f32 to vector<4x16x128xf32>
      %c0 = arith.constant 0 : index
      %c0_8 = arith.constant 0 : index
      %c0_9 = arith.constant 0 : index
      %16 = vector.load %arg8[%c0, %c0_8, %c0_9] : memref<4x16x128xf32, #tpu.memory_space<vmem>>, vector<4x16x128xf32>
      tpu.vector_store %arg8[%c0, %c0_8, %c0_9], %15 {strides = array<i32>} : memref<4x16x128xf32, #tpu.memory_space<vmem>>, vector<4x16x128xf32>,
      %c0_10 = arith.constant 0 : index
      %c0_11 = arith.constant 0 : index
      %c0_12 = arith.constant 0 : index
      %c0_13 = arith.constant 0 : index
      %17 = vector.load %arg3[%c0_10, %c0_11, %c0_12, %c0_13] : memref<1x4x16x128xf32, #tpu.memory_space<vmem>>, vector<1x4x16x128xf32>
      %18 = vector.shape_cast %17 : vector<1x4x16x128xf32> to vector<4x16x128xf32>
      %cst_14 = arith.constant 0.0883883461 : f32
      %19 = vector.broadcast %cst_14 : f32 to vector<4x16x128xf32>
      %20 = arith.mulf %18, %19 : vector<4x16x128xf32>
      %c0_15 = arith.constant 0 : index
      %c0_16 = arith.constant 0 : index
      %c0_17 = arith.constant 0 : index
      %21 = vector.load %arg9[%c0_15, %c0_16, %c0_17] : memref<4x16x128xf32, #tpu.memory_space<vmem>>, vector<4x16x128xf32>
      tpu.vector_store %arg9[%c0_15, %c0_16, %c0_17], %20 {strides = array<i32>} : memref<4x16x128xf32, #tpu.memory_space<vmem>>, vector<4x16x128xf32>,
    } else {
    }
    %c1_i32 = arith.constant 1 : i32
    %3 = arith.cmpi slt, %arg2, %c1_i32 : i32
    %4 = arith.extui %3 : i1 to i32
    %c0_i32_1 = arith.constant 0 : i32
    %5 = arith.cmpi ne, %4, %c0_i32_1 : i32
    scf.if %5 {
      %c0 = arith.constant 0 : index
      %c0_8 = arith.constant 0 : index
      %c0_9 = arith.constant 0 : index
      %c0_10 = arith.constant 0 : index
      %15 = vector.load %arg4[%c0, %c0_8, %c0_9, %c0_10] : memref<1x4x16x128xf32, #tpu.memory_space<vmem>>, vector<1x4x16x128xf32>
      %16 = vector.shape_cast %15 : vector<1x4x16x128xf32> to vector<4x16x128xf32>
      %c0_11 = arith.constant 0 : index
      %c0_12 = arith.constant 0 : index
      %c0_13 = arith.constant 0 : index
      %17 = vector.load %arg9[%c0_11, %c0_12, %c0_13] : memref<4x16x128xf32, #tpu.memory_space<vmem>>, vector<4x16x128xf32>
      "tpu.trace_start"() <{level = 10 : i32, message = "hid,hjd->hij"}> : () -> ()
      %cst = arith.constant dense<0.000000e+00> : vector<4x16x16xf32>
      %18 = tpu.matmul %17, %16, %cst {dimension_numbers = #tpu.dot_dimension_numbers<[2], [2], [1], [1], [0, 0, 0, 1, 1, 1], [0], [0]>} : vector<4x16x128xf32>, vector<4x16x128xf32>, vector<4x16x16xf32> -> vector<4x16x16xf32>
      "tpu.trace_stop"() : () -> ()
      %cst_14 = arith.constant dense<0xFF800000> : vector<16x16xf32>
      %19 = vector.multi_reduction <maximumf>, %18, %cst_14 [0] : vector<4x16x16xf32> to vector<16x16xf32>
      %20 = vector.shape_cast %19 : vector<16x16xf32> to vector<1x16x16xf32>
      %21 = vector.broadcast %20 : vector<1x16x16xf32> to vector<4x16x16xf32>
      %22 = arith.subf %18, %21 : vector<4x16x16xf32>
      %23 = math.exp %22 : vector<4x16x16xf32>
      %cst_15 = arith.constant dense<0.000000e+00> : vector<16x16xf32>
      %24 = vector.multi_reduction <add>, %23, %cst_15 [0] : vector<4x16x16xf32> to vector<16x16xf32>
      %25 = vector.shape_cast %24 : vector<16x16xf32> to vector<1x16x16xf32>
      %26 = tpu.reciprocal %25 {approx = true} : vector<1x16x16xf32> -> vector<1x16x16xf32>
      %27 = vector.broadcast %26 : vector<1x16x16xf32> to vector<4x16x16xf32>
      %28 = arith.mulf %23, %27 : vector<4x16x16xf32>
      %c0_16 = arith.constant 0 : index
      %c0_17 = arith.constant 0 : index
      %c0_18 = arith.constant 0 : index
      %29 = vector.load %arg8[%c0_16, %c0_17, %c0_18] : memref<4x16x128xf32, #tpu.memory_space<vmem>>, vector<4x16x128xf32>
      "tpu.trace_start"() <{level = 10 : i32, message = "hij,hjd->hid"}> : () -> ()
      %cst_19 = arith.constant dense<0.000000e+00> : vector<4x16x128xf32>
      %30 = tpu.matmul %28, %16, %cst_19 {dimension_numbers = #tpu.dot_dimension_numbers<[2], [1], [1], [2], [0, 0, 0, 1, 1, 2], [0], [0]>} : vector<4x16x16xf32>, vector<4x16x128xf32>, vector<4x16x128xf32> -> vector<4x16x128xf32>
      "tpu.trace_stop"() : () -> ()
      %31 = arith.addf %29, %30 : vector<4x16x128xf32>
      %c0_20 = arith.constant 0 : index
      %c0_21 = arith.constant 0 : index
      %c0_22 = arith.constant 0 : index
      %32 = vector.load %arg8[%c0_20, %c0_21, %c0_22] : memref<4x16x128xf32, #tpu.memory_space<vmem>>, vector<4x16x128xf32>
      tpu.vector_store %arg8[%c0_20, %c0_21, %c0_22], %31 {strides = array<i32>} : memref<4x16x128xf32, #tpu.memory_space<vmem>>, vector<4x16x128xf32>,
    } else {
    }
    %c1_i32_2 = arith.constant 1 : i32
    %6 = arith.cmpi eq, %arg2, %c1_i32_2 : i32
    %7 = arith.extui %6 : i1 to i32
    %c0_i32_3 = arith.constant 0 : i32
    %8 = arith.cmpi ne, %7, %c0_i32_3 : i32
    scf.if %8 {
      %c0 = arith.constant 0 : index
      %c0_8 = arith.constant 0 : index
      %c0_9 = arith.constant 0 : index
      %15 = vector.load %arg8[%c0, %c0_8, %c0_9] : memref<4x16x128xf32, #tpu.memory_space<vmem>>, vector<4x16x128xf32>
      %cst = arith.constant 0.0883883461 : f32
      %16 = vector.broadcast %cst : f32 to vector<4x16x128xf32>
      %17 = arith.mulf %15, %16 : vector<4x16x128xf32>
      %c0_10 = arith.constant 0 : index
      %c0_11 = arith.constant 0 : index
      %c0_12 = arith.constant 0 : index
      %18 = vector.load %arg9[%c0_10, %c0_11, %c0_12] : memref<4x16x128xf32, #tpu.memory_space<vmem>>, vector<4x16x128xf32>
      tpu.vector_store %arg9[%c0_10, %c0_11, %c0_12], %17 {strides = array<i32>} : memref<4x16x128xf32, #tpu.memory_space<vmem>>, vector<4x16x128xf32>,
      %cst_13 = arith.constant 0.000000e+00 : f32
      %19 = vector.broadcast %cst_13 : f32 to vector<4x16x128xf32>
      %c0_14 = arith.constant 0 : index
      %c0_15 = arith.constant 0 : index
      %c0_16 = arith.constant 0 : index
      %20 = vector.load %arg8[%c0_14, %c0_15, %c0_16] : memref<4x16x128xf32, #tpu.memory_space<vmem>>, vector<4x16x128xf32>
      tpu.vector_store %arg8[%c0_14, %c0_15, %c0_16], %19 {strides = array<i32>} : memref<4x16x128xf32, #tpu.memory_space<vmem>>, vector<4x16x128xf32>,
    } else {
    }
    %c1_i32_4 = arith.constant 1 : i32
    %9 = arith.cmpi sge, %arg2, %c1_i32_4 : i32
    %10 = arith.extui %9 : i1 to i32
    %c0_i32_5 = arith.constant 0 : i32
    %11 = arith.cmpi ne, %10, %c0_i32_5 : i32
    scf.if %11 {
      %c0 = arith.constant 0 : index
      %c0_8 = arith.constant 0 : index
      %c0_9 = arith.constant 0 : index
      %c0_10 = arith.constant 0 : index
      %15 = vector.load %arg5[%c0, %c0_8, %c0_9, %c0_10] : memref<1x4x16x128xf32, #tpu.memory_space<vmem>>, vector<1x4x16x128xf32>
      %16 = vector.shape_cast %15 : vector<1x4x16x128xf32> to vector<4x16x128xf32>
      %c0_11 = arith.constant 0 : index
      %c0_12 = arith.constant 0 : index
      %c0_13 = arith.constant 0 : index
      %17 = vector.load %arg9[%c0_11, %c0_12, %c0_13] : memref<4x16x128xf32, #tpu.memory_space<vmem>>, vector<4x16x128xf32>
      "tpu.trace_start"() <{level = 10 : i32, message = "hid,hjd->hij"}> : () -> ()
      %cst = arith.constant dense<0.000000e+00> : vector<4x16x16xf32>
      %18 = tpu.matmul %17, %16, %cst {dimension_numbers = #tpu.dot_dimension_numbers<[2], [2], [1], [1], [0, 0, 0, 1, 1, 1], [0], [0]>} : vector<4x16x128xf32>, vector<4x16x128xf32>, vector<4x16x16xf32> -> vector<4x16x16xf32>
      "tpu.trace_stop"() : () -> ()
      %cst_14 = arith.constant dense<0xFF800000> : vector<16x16xf32>
      %19 = vector.multi_reduction <maximumf>, %18, %cst_14 [0] : vector<4x16x16xf32> to vector<16x16xf32>
      %20 = vector.shape_cast %19 : vector<16x16xf32> to vector<1x16x16xf32>
      %21 = vector.broadcast %20 : vector<1x16x16xf32> to vector<4x16x16xf32>
      %22 = arith.subf %18, %21 : vector<4x16x16xf32>
      %23 = math.exp %22 : vector<4x16x16xf32>
      %cst_15 = arith.constant dense<0.000000e+00> : vector<16x16xf32>
      %24 = vector.multi_reduction <add>, %23, %cst_15 [0] : vector<4x16x16xf32> to vector<16x16xf32>
      %25 = vector.shape_cast %24 : vector<16x16xf32> to vector<1x16x16xf32>
      %26 = tpu.reciprocal %25 {approx = true} : vector<1x16x16xf32> -> vector<1x16x16xf32>
      %27 = vector.broadcast %26 : vector<1x16x16xf32> to vector<4x16x16xf32>
      %28 = arith.mulf %23, %27 : vector<4x16x16xf32>
      %c0_16 = arith.constant 0 : index
      %c0_17 = arith.constant 0 : index
      %c0_18 = arith.constant 0 : index
      %29 = vector.load %arg8[%c0_16, %c0_17, %c0_18] : memref<4x16x128xf32, #tpu.memory_space<vmem>>, vector<4x16x128xf32>
      "tpu.trace_start"() <{level = 10 : i32, message = "hij,hjd->hid"}> : () -> ()
      %cst_19 = arith.constant dense<0.000000e+00> : vector<4x16x128xf32>
      %30 = tpu.matmul %28, %16, %cst_19 {dimension_numbers = #tpu.dot_dimension_numbers<[2], [1], [1], [2], [0, 0, 0, 1, 1, 2], [0], [0]>} : vector<4x16x16xf32>, vector<4x16x128xf32>, vector<4x16x128xf32> -> vector<4x16x128xf32>
      "tpu.trace_stop"() : () -> ()
      %31 = arith.addf %29, %30 : vector<4x16x128xf32>
      %c0_20 = arith.constant 0 : index
      %c0_21 = arith.constant 0 : index
      %c0_22 = arith.constant 0 : index
      %32 = vector.load %arg8[%c0_20, %c0_21, %c0_22] : memref<4x16x128xf32, #tpu.memory_space<vmem>>, vector<4x16x128xf32>
      tpu.vector_store %arg8[%c0_20, %c0_21, %c0_22], %31 {strides = array<i32>} : memref<4x16x128xf32, #tpu.memory_space<vmem>>, vector<4x16x128xf32>,
    } else {
    }
    %c1_i32_6 = arith.constant 1 : i32
    %12 = arith.cmpi eq, %arg2, %c1_i32_6 : i32
    %13 = arith.extui %12 : i1 to i32
    %c0_i32_7 = arith.constant 0 : i32
    %14 = arith.cmpi ne, %13, %c0_i32_7 : i32
    scf.if %14 {
      %c0 = arith.constant 0 : index
      %c0_8 = arith.constant 0 : index
      %c0_9 = arith.constant 0 : index
      %15 = vector.load %arg8[%c0, %c0_8, %c0_9] : memref<4x16x128xf32, #tpu.memory_space<vmem>>, vector<4x16x128xf32>
      %c0_10 = arith.constant 0 : index
      %c0_11 = arith.constant 0 : index
      %c0_12 = arith.constant 0 : index
      %c0_13 = arith.constant 0 : index
      %16 = vector.load %arg6[%c0_10, %c0_11, %c0_12, %c0_13] : memref<1x4x16x128xf32, #tpu.memory_space<vmem>>, vector<1x4x16x128xf32>
      %17 = vector.shape_cast %16 : vector<1x4x16x128xf32> to vector<4x16x128xf32>
      %18 = arith.addf %15, %17 : vector<4x16x128xf32>
      %c0_14 = arith.constant 0 : index
      %c0_15 = arith.constant 0 : index
      %c0_16 = arith.constant 0 : index
      %c0_17 = arith.constant 0 : index
      %19 = vector.load %arg7[%c0_14, %c0_15, %c0_16, %c0_17] : memref<1x4x16x128xf32, #tpu.memory_space<vmem>>, vector<1x4x16x128xf32>
      %20 = vector.shape_cast %19 : vector<1x4x16x128xf32> to vector<4x16x128xf32>
      %21 = vector.shape_cast %18 : vector<4x16x128xf32> to vector<1x4x16x128xf32>
      tpu.vector_store %arg7[%c0_14, %c0_15, %c0_16, %c0_17], %21 {strides = array<i32>} : memref<1x4x16x128xf32, #tpu.memory_space<vmem>>, vector<1x4x16x128xf32>,
    } else {
    }
    return
  }
  func.func @transform_0(%arg0: i32, %arg1: i32, %arg2: i32) -> (i32, i32, i32, i32) {
    %c0_i32 = arith.constant 0 : i32
    %c0_i32_0 = arith.constant 0 : i32
    %c0_i32_1 = arith.constant 0 : i32
    return %arg0, %c0_i32, %arg1, %c0_i32_0 : i32, i32, i32, i32
  }
  func.func @transform_1(%arg0: i32, %arg1: i32, %arg2: i32) -> (i32, i32, i32, i32) {
    %c0_i32 = arith.constant 0 : i32
    %0 = arith.minsi %arg2, %c0_i32 : i32
    %c0_i32_0 = arith.constant 0 : i32
    %c0_i32_1 = arith.constant 0 : i32
    %c0_i32_2 = arith.constant 0 : i32
    return %arg0, %c0_i32_0, %0, %c0_i32_1 : i32, i32, i32, i32
  }
  func.func @transform_2(%arg0: i32, %arg1: i32, %arg2: i32) -> (i32, i32, i32, i32) {
    %c1_i32 = arith.constant 1 : i32
    %0 = arith.subi %arg2, %c1_i32 : i32
    %c0_i32 = arith.constant 0 : i32
    %1 = arith.maxsi %0, %c0_i32 : i32
    %c0_i32_0 = arith.constant 0 : i32
    %c0_i32_1 = arith.constant 0 : i32
    %c0_i32_2 = arith.constant 0 : i32
    return %arg0, %c0_i32_0, %1, %c0_i32_1 : i32, i32, i32, i32
  }
  func.func @transform_3(%arg0: i32, %arg1: i32, %arg2: i32) -> (i32, i32, i32, i32) {
    %c0_i32 = arith.constant 0 : i32
    %c0_i32_0 = arith.constant 0 : i32
    %c0_i32_1 = arith.constant 0 : i32
    return %arg0, %c0_i32, %arg1, %c0_i32_0 : i32, i32, i32, i32
  }
  func.func @transform_4(%arg0: i32, %arg1: i32, %arg2: i32) -> (i32, i32, i32, i32) {
    %c0_i32 = arith.constant 0 : i32
    %c0_i32_0 = arith.constant 0 : i32
    %c0_i32_1 = arith.constant 0 : i32
    return %arg0, %c0_i32, %arg1, %c0_i32_0 : i32, i32, i32, i32
  }
}

</mosaic_0001>

<bundles_post_ra>
// kernel: tpu_custom_call.1
= control target key start
LH: loop header
LB: loop body
LE: loop exit
PB: predicated region body
PF: predicated region fallthrough
CT: control target
= control target key end

     0   :  { %s2343_s0 = inlined_call_operand.hbm [shape: f32[2,4,16,128], index: 0, kind: input, shape index: {}]   ;;  %s2344_s1 = inlined_call_operand.hbm [shape: f32[2,4,16,128], index: 1, kind: input, shape index: {}]   ;;  %s2345_s2 = inlined_call_operand.hbm [shape: f32[2,4,16,128], index: 2, kind: input, shape index: {}]   ;;  %s2346_s3 = inlined_call_operand.hbm [shape: f32[2,4,16,128], index: 3, kind: input, shape index: {}]   ;;  %s2347_s4 = inlined_call_operand.hbm [shape: f32[2,4,16,128], index: 4, kind: output, shape index: {}]  }
   0x1   :  { %2364 = sst [smem:[#allocation31_spill]] %s2343_s0 }
   0x2   :  { %2365 = sst [smem:[#allocation32_spill]] %s2344_s1 }
   0x3   :  { %2366 = sst [smem:[#allocation33_spill]] %s2347_s4 }
   0x4   :  { %9 = vsyncpa [#allocation5], 0 }
   0x5   :  { %11 = vsyncpa [#allocation5 + $0x1], 0 }
   0x6   :  { %12 = vsyncpa [#allocation8], 0 }
   0x7   :  { %14 = vsyncpa [#allocation8 + $0x1], 0 }
   0x8   :  { %15 = vsyncpa [#allocation11], 0 }
   0x9   :  { %17 = vsyncpa [#allocation11 + $0x1], 0 }
   0xa   :  { %18 = vsyncpa [#allocation6], 0 }
   0xb   :  { %20 = vsyncpa [#allocation6 + $0x1], 0  ;;  %s1882_s15 = smov 0   ;;  %s1884_s16 = smov 0  }
   0xc   :  { %s1886_s17 = smov 0   ;;  %s1888_s18 = smov 0  }
   0xd   :  { %s1890_s19 = smov 0   ;;  %s1892_s20 = smov 0  }
   0xe   :  { %s1894_s21 = smov 0   ;;  %s1896_s22 = smov 0  }
   0xf   :  { %s1898_s23 = smov 0   ;;  %s1900_s24 = smov 0  }
  0x10   :  { %s1902_s25 = smov 0   ;;  %s1904_s26 = smov 0  }
  0x11   :  { %s1906_s27 = smov 0   ;;  %s1908_s28 = smov 0  }
  0x12 LB: > { %2367 = sst [smem:[#allocation18_spill]] %s1817_s20  ;;  %s1951_s29 = sadd.s32 4294967295, %s1849_s28   ;;  %s1849_s28 = sphi %s1908_s28, %s26_s28   ;;  %s1845_s27 = sphi %s1906_s27, %s2415_s27   ;;  %s1841_s26 = sphi %s1904_s26, %s2426_s26   ;;  %s1837_s25 = sphi %s1902_s25, %s2425_s25   ;;  %s1833_s24 = sphi %s1900_s24, %s2424_s24   ;;  %s1829_s23 = sphi %s1898_s23, %s2411_s23   ;;  %s1825_s22 = sphi %s1896_s22, %s2423_s22   ;;  %s1821_s21 = sphi %s1894_s21, %s2422_s21   ;;  %s1817_s20 = sphi %s1892_s20, %s2409_s20   ;;  %s1813_s19 = sphi %s1890_s19, %s2421_s19   ;;  %s1809_s18 = sphi %s1888_s18, %s2420_s18   ;;  %s1805_s17 = sphi %s1886_s17, %s2419_s17   ;;  %s1801_s16 = sphi %s1884_s16, %s2418_s16   ;;  %s1797_s15 = sphi %s1882_s15, %s2417_s15  }
  0x13   : > { %2368 = sst [smem:[#allocation19_spill]] %s1821_s21  ;;  %s38_s30 = sadd.s32 1, %s1841_s26 }
  0x14   : > { %2369 = sst [smem:[#allocation20_spill]] %s1829_s23  ;;  %p39_p0 = scmp.ge.s32.totalorder %s38_s30, 2 }
  0x15   : > { %2370 = sst [smem:[#allocation21_spill]] %s1837_s25  ;;  %s45_s5 = sadd.s32 1, %s1845_s27 }
  0x16   : > { %2371 = sst [smem:[#allocation22_spill]] %s1841_s26  ;;  %p62_p1 = scmp.eq.s32.totalorder %s1849_s28, 0 }
  0x17   : > { %2372 = sst [smem:[#allocation23_spill]] %s1845_s27  ;;  %p68_p2 = scmp.eq.s32.totalorder %s1951_s29, 0 }
  0x18   : > { %s2428_s30 = smov (%p39_p0, %s38_s30), 0  ;;  %s2430_s5 = smov (!%p39_p0, %s45_s5), %s1845_s27 }
  0x19   : > { %2373 = sst [smem:[#allocation24_spill]] %s2428_s30  ;;  %p47_p3 = scmp.ge.s32.totalorder %s2430_s5, 2 }
  0x1a   : > { %s86_s6 = sadd.s32 1, %s1817_s20  ;;  %p93_p4 = scmp.ne.s32.totalorder %s1817_s20, %s1813_s19 }
  0x1b   : > { %s2432_s5 = smov (%p47_p3, %s2430_s5), 0  ;;  %p99_p7 = scmp.ne.s32.totalorder %s1813_s19, %s1809_s18 }
  0x1c   : > { %2374 = sst [smem:[#allocation25_spill]] %s2432_s5  ;;  %s49_s7 = ssub.s32 %s1845_s27, %s2432_s5 }
  0x1d   : > { %p1967_p5 = scmp.eq.s32.totalorder %s49_s7, 0  ;;  %p1973_p6 = por %p93_p4, %p62_p1 }
  0x1e   : > { %p1985_p8 = por %p99_p7, %p68_p2  ;;  %p1409_p9 = scmp.lt.s32.totalorder %s1849_s28, 4 }
  0x1f   : > { %s1981_s10 = scalar_select %p1967_p5, %s1817_s20, %s86_s6  }
  0x20   : > { %s237_s12 = sand.u32 1, %s1849_s28   ;;  %s239_s13 = sand.u32 1, %s1817_s20  }
  0x21   : > { %2377 = sst [smem:[#allocation26_spill]] %s1981_s10  ;;  %s1335_s14 = sshll.u32 %s239_s13, 6 }
  0x22   : > { %s1993_s7 = sshll.u32 %s1845_s27, 6  ;;  %s241_s5 = scalar_lea.vmem [#allocation7], %s1335_s14 }
  0x23   : > { %s253_s30 = sshll.u32 %s241_s5, 4  ;;  %s2379_s1 = sld [smem:[#allocation32_spill]]  ;;  %s254_s30 = int_to_ptr.vmem [resolvable:$true] %s253_s30 }
  0x24   : > { %p2003_p10 = pnand %p1409_p9, %p1973_p6  ;;  %s2007_s13 = scalar_lea.sflag [#allocation8], %s237_s12 }
  0x26   : > { %p1573_p12 = pneg %p2003_p10 }
  0x29   : > { %s250_s18 = scalar_lea.hbm %s2379_s1, %s1993_s7  ;;  %s1576_s5 = scalar_lea.hbm %s2379_s1, 128 }
  0x2a   : > { %s251_s6 = sshll.u32 %s250_s18, 4  ;;  %s252_s6 = int_to_ptr.hbm [resolvable:$true] %s251_s6 }
  0x2b   : > { %s1569_s27 = sshra.s32 %s252_s6, 4  ;;  %s1570_s27 = int_to_ptr.hbm [resolvable:$true] %s1569_s27 }
  0x2c   : > { %s1571_s14 = scalar_lea.hbm %s1570_s27, 64 }
  0x2d   : > { %p1572_p11 = scmp.ne.s32.totalorder %s1570_s27, %s1571_s14  ;;  %p1578_p3 = scmp.lt.s32.totalorder %s1576_s5, %s1571_s14 }
  0x2f   : > { %p1574_p13 = pnand %p1573_p12, %p1572_p11 }
  0x31   : > { %p1575_p0 = pneg %p1574_p13 }
  0x33   : > { %p1580_p4 = pnand %p1578_p3, %p1575_p0 }
  0x35   : > { %1583 = shalt.err (!%p1580_p4)
}
  0x36   : > { %s2352_s9 = smov 128   ;;  %s2354_s27 = smov 8  }
  0x37   : > { %1398 = dma.hbm_to_vmem [thread:$0]  (!%p2003_p10), %s252_s6, 1024, %s254_s30, %s2007_s13, %s2352_s9, %s2352_s9, %s2354_s27  }
  0x38   : > { %p1347_p6 = scmp.ge.s32.totalorder %s1849_s28, 1  ;;  %p312_p7 = scmp.lt.s32.totalorder %s1849_s28, 5 }
  0x39   : > { %s1327_s26 = sadd.s32 4294967294, %s1849_s28   ;;  %s54_s5 = sadd.s32 1, %s1829_s23 }
  0x3a   : > { %p2026_p11 = pnand %p1347_p6, %p312_p7  ;;  %p61_p12 = scmp.ne.s32.totalorder %s1829_s23, %s1825_s22 }
  0x3b   : > { %s2037_s10 = scalar_select %p1967_p5, %s1829_s23, %s54_s5  }
  0x3c   : > { %p2041_p10 = por %p62_p1, %p61_p12  ;;  %p67_p13 = scmp.ne.s32.totalorder %s1825_s22, %s1821_s21 }
  0x3d   : > { %2382 = sst [smem:[#allocation27_spill]] %s2037_s10  ;;  %p187_p0 = scmp.eq.s32.totalorder %s1951_s29, 3 }
  0x3e   : > { %p193_p3 = scmp.eq.s32.totalorder %s1327_s26, 3  ;;  %p2050_p4 = por %p68_p2, %p67_p13 }
  0x3f   : > { %s2055_s12 = sand.u32 1, %s1829_s23   ;;  %p2057_p6 = por %p187_p0, %p61_p12 }
  0x40   : > { %p2061_p7 = por %p193_p3, %p67_p13  ;;  %s2359_s5 = sshll.u32 %s2055_s12, 6 }
  0x41   : > { %s2385_s18 = scalar_select %p2057_p6, 1, 0 }
  0x42   : > { %s2387_s26 = scalar_select %p2061_p7, 1, 0 }
  0x43   : > { %2386 = sst [smem:[#allocation28_spill]] %s2385_s18  ;;  %s217_s1 = scalar_lea.vmem [#allocation4], %s2359_s5 }
  0x44   : > { %2388 = sst [smem:[#allocation29_spill]] %s2387_s26  ;;  %s227_s10 = sshll.u32 %s217_s1, 4  ;;  %s228_s10 = int_to_ptr.vmem [resolvable:$true] %s227_s10 }
  0x45   : > { %s2389_s0 = sld [smem:[#allocation31_spill]]  ;;  %p2076_p12 = pnand %p1409_p9, %p2041_p10 }
  0x46   : > { %s214_s26 = scalar_lea.sflag [#allocation5], %s2055_s12  ;;  %s2391_s9 = smov 8  }
  0x47   : > { %s2392_s14 = smov 128   ;;  %p127_p13 = scmp.ne.s32.totalorder %s1805_s17, %s1801_s16 }
  0x48   : > { %p133_p0 = scmp.ne.s32.totalorder %s1801_s16, %s1797_s15  ;;  %s2394_s21 = scalar_lea.hbm %s2345_s2, %s1993_s7 }
  0x49   : > { %s278_s18 = sshll.u32 %s2394_s21, 4  ;;  %p129_p10 = por %p127_p13, %p62_p1  ;;  %s279_s18 = int_to_ptr.hbm [resolvable:$true] %s278_s18 }
  0x4a   : > { %p2106_p3 = por %p133_p0, %p68_p2 }
  0x4b   : > { %s224_s27 = scalar_lea.hbm %s2389_s0, %s1993_s7  ;;  %s120_s0 = sadd.s32 1, %s1805_s17 }
  0x4c   : > { %s225_s23 = sshll.u32 %s224_s27, 4  ;;  %s265_s27 = sand.u32 1, %s1805_s17   ;;  %s226_s23 = int_to_ptr.hbm [resolvable:$true] %s225_s23 }
  0x4d   : > { %1395 = dma.hbm_to_vmem [thread:$0]  (!%p2076_p12), %s226_s23, 1024, %s228_s10, %s214_s26, %s2392_s14, %s2392_s14, %s2391_s9  }
  0x4e   : > { %s2090_s1 = scalar_select %p1967_p5, %s1805_s17, %s120_s0  }
  0x4f   : > { %s1339_s23 = sshll.u32 %s265_s27, 6  ;;  %p2112_p5 = pnand %p1409_p9, %p129_p10 }
  0x50   : > { %2393 = sst [smem:[#allocation30_spill]] %s2090_s1  ;;  %s267_s15 = scalar_lea.vmem [#allocation9], %s1339_s23 }
  0x51   : > { %s280_s8 = sshll.u32 %s267_s15, 4  ;;  %s1629_s10 = sshra.s32 %s279_s18, 4  ;;  %s281_s8 = int_to_ptr.vmem [resolvable:$true] %s280_s8  ;;  %s1630_s10 = int_to_ptr.hbm [resolvable:$true] %s1629_s10 }
  0x52   : > { %s1631_s21 = scalar_lea.hbm %s1630_s10, 64  ;;  %p1633_p2 = pneg %p2112_p5 }
  0x53   : > { %p1632_p1 = scmp.ne.s32.totalorder %s1630_s10, %s1631_s21  ;;  %s1636_s27 = scalar_lea.hbm %s2345_s2, 128 }
  0x54   : > { %p1637_p9 = scmp.lt.s32.totalorder %s1630_s10, %s2345_s2  ;;  %p1638_p10 = scmp.lt.s32.totalorder %s1636_s27, %s1631_s21 }
  0x55   : > { %p1634_p13 = pnand %p1633_p2, %p1632_p1 }
  0x56   : > { %p1639_p7 = por %p1638_p10, %p1637_p9 }
  0x57   : > { %p1635_p0 = pneg %p1634_p13 }
  0x59   : > { %p1640_p6 = pnand %p1639_p7, %p1635_p0 }
  0x5b   : > { %1643 = shalt.err (!%p1640_p6)
}
  0x5c   : > { %1401 = dma.hbm_to_vmem [thread:$0]  (!%p2112_p5), %s279_s18, 1024, %s281_s8, %s2007_s13, %s2392_s14, %s2392_s14, %s2391_s9  }
  0x5d   : > { %s301_s1 = scalar_lea.hbm %s2346_s3, %s1993_s7  ;;  %s2397_s21 = sshll.u32 %s2055_s12, 6 }
  0x5e   : > { %s302_s10 = sshll.u32 %s301_s1, 4  ;;  %s294_s26 = scalar_lea.vmem [#allocation10], %s2397_s21  ;;  %s303_s10 = int_to_ptr.hbm [resolvable:$true] %s302_s10 }
  0x5f   : > { %s304_s5 = sshll.u32 %s294_s26, 4  ;;  %s291_s0 = scalar_lea.sflag [#allocation11], %s2055_s12  ;;  %s305_s5 = int_to_ptr.vmem [resolvable:$true] %s304_s5 }
  0x60   : > { %1404 = dma.hbm_to_vmem [thread:$0]  (!%p2076_p12), %s303_s10, 1024, %s305_s5, %s291_s0, %s2392_s14, %s2392_s14, %s2391_s9  }
  0x61   : > { %316 = sbr.rel (%p2026_p11) target bundleno = 851 (0x353), region = 36  ;;  %s2145_s13 = sand.u32 (!%p2026_p11), 1, %s1825_s22  }
  0x62   : > { %s1348_s7 = sshll.u32 (!%p2026_p11), %s2145_s13, 6  ;;  %s319_s18 = scalar_lea.sflag (!%p2026_p11), [#allocation5], %s2145_s13 }
  0x63   : > { %s2149_s8 = scalar_lea.vmem (!%p2026_p11), [#allocation4], %s1348_s7 }
  0x66   : > { %1774 = dma.done.wait (%p2050_p4), %s319_s18, 1024  }
  0x67   : > { %1776 = vsyncadd (%p2050_p4), %s319_s18, 4294966272  ;;  %s328_s20 = sand.u32 1, %s1951_s29   ;;  %s330_s4 = sand.u32 1, %s1813_s19  }
  0x68   : > { %s1349_s12 = sshll.u32 %s330_s4, 6  ;;  %s329_s9 = scalar_lea.sflag [#allocation8], %s328_s20 }
  0x69   : > { %s2157_s14 = scalar_lea.vmem [#allocation7], %s1349_s12 }
  0x6a   : > { %1778 = dma.done.wait (%p1985_p8), %s329_s9, 1024  }
  0x6b   : > { %1780 = vsyncadd (%p1985_p8), %s329_s9, 4294966272  ;;  %s340_s27 = sand.u32 1, %s1801_s16  }
  0x6c   : > { %s1350_s30 = sshll.u32 %s340_s27, 6 }
  0x6d   : > { %s2164_s23 = scalar_lea.vmem [#allocation9], %s1350_s30 }
  0x6e   : > { %1782 = dma.done.wait (%p2106_p3), %s329_s9, 1024  }
  0x6f   : > { %1784 = vsyncadd (%p2106_p3), %s329_s9, 4294966272  ;;  %s349_s29 = scalar_lea.sflag [#allocation11], %s2145_s13  ;;  %s2171_s15 = scalar_lea.vmem [#allocation10], %s1348_s7 }
  0x70   : > { %1786 = dma.done.wait (%p2050_p4), %s349_s29, 1024  }
  0x71   : > { %1788 = vsyncadd (%p2050_p4), %s349_s29, 4294966272  ;;  %s2177_s11 = scalar_lea.vmem [#allocation12], %s1348_s7  ;;  %p1353_p8 = scmp.ne.s32.totalorder %s1833_s24, 0 }
  0x73   : > { %406 = sbr.rel (%p1353_p8) target bundleno = 137 (0x89), region = 56 }
  0x78   : > { %v1853_v0 = vmov 0.0   ;;  %v415_v1 = vld [vmem:[%s2149_s8] sm:$0xff]  ;;  %v416_v2 = vld [vmem:[%s2149_s8 + $0x8] sm:$0xff]  ;;  %v417_v3 = vld [vmem:[%s2149_s8 + $0x10] sm:$0xff] }
  0x79   : > { %407 = vst [vmem:[#allocation2 + $0x30] sm:$0xff] %v1853_v0  ;;  %v423_v4 = vmul.f32 0.088388346, %v415_v1  ;;  %v418_v5 = vld [vmem:[%s2149_s8 + $0x18] sm:$0xff]  ;;  %v424_v6 = vmul.f32 0.088388346, %v416_v2 }
  0x7a   : > { %408 = vst [vmem:[#allocation2] sm:$0xff] %v1853_v0  ;;  %v419_v7 = vld [vmem:[%s2149_s8 + $0x20] sm:$0xff]  ;;  %v425_v8 = vmul.f32 0.088388346, %v417_v3  ;;  %v420_v9 = vld [vmem:[%s2149_s8 + $0x28] sm:$0xff]  ;;  %v421_v11 = vld [vmem:[%s2149_s8 + $0x30] sm:$0xff] }
  0x7b   : > { %409 = vst [vmem:[#allocation2 + $0x18] sm:$0xff] %v1853_v0  ;;  %v426_v10 = vmul.f32 0.088388346, %v418_v5  ;;  %v427_v12 = vmul.f32 0.088388346, %v419_v7  ;;  %v422_v13 = vld [vmem:[%s2149_s8 + $0x38] sm:$0xff] }
  0x7c   : > { %410 = vst [vmem:[#allocation2 + $0x10] sm:$0xff] %v1853_v0  ;;  %v428_v14 = vmul.f32 0.088388346, %v420_v9  ;;  %v429_v15 = vmul.f32 0.088388346, %v421_v11 }
  0x7d   : > { %411 = vst [vmem:[#allocation2 + $0x8] sm:$0xff] %v1853_v0  ;;  %v430_v16 = vmul.f32 0.088388346, %v422_v13 }
  0x7e   : > { %412 = vst [vmem:[#allocation2 + $0x20] sm:$0xff] %v1853_v0 }
  0x7f   : > { %413 = vst [vmem:[#allocation2 + $0x28] sm:$0xff] %v1853_v0 }
  0x80   : > { %414 = vst [vmem:[#allocation2 + $0x38] sm:$0xff] %v1853_v0 }
  0x81   : > { %431 = vst [vmem:[#allocation3] sm:$0xff] %v423_v4 }
  0x82   : > { %432 = vst [vmem:[#allocation3 + $0x18] sm:$0xff] %v424_v6 }
  0x83   : > { %433 = vst [vmem:[#allocation3 + $0x10] sm:$0xff] %v425_v8 }
  0x84   : > { %434 = vst [vmem:[#allocation3 + $0x20] sm:$0xff] %v426_v10 }
  0x85   : > { %435 = vst [vmem:[#allocation3 + $0x28] sm:$0xff] %v427_v12 }
  0x86   : > { %436 = vst [vmem:[#allocation3 + $0x8] sm:$0xff] %v428_v14 }
  0x87   : > { %437 = vst [vmem:[#allocation3 + $0x30] sm:$0xff] %v429_v15 }
  0x88   : > { %438 = vst [vmem:[#allocation3 + $0x38] sm:$0xff] %v430_v16 }
  0x89 PF: > { %p1354_p11 = scmp.ge.s32.totalorder %s1833_s24, 1 }
  0x8b   : > { %442 = sbr.rel (%p1354_p11) target bundleno = 462 (0x1ce), region = 60 }
  0x90   : > { %v448_v17 = vld [vmem:[%s2157_s14 + $0x28] sm:$0xff]  ;;  %v450_v18 = vld [vmem:[%s2157_s14 + $0x38] sm:$0xff]  ;;  %v447_v21 = vld [vmem:[%s2157_s14 + $0x20] sm:$0xff]  ;;  %vm551_vm0 = vcmask 130048  }
  0x91   : > { %519 = vmatpush.xpose.msra.mxu2 %v448_v17  ;;  %542 = vmatpush.xpose.msra.mxu3 %v450_v18  ;;  %v444_v19 = vld [vmem:[%s2157_s14 + $0x8] sm:$0xff]  ;;  %v446_v20 = vld [vmem:[%s2157_s14 + $0x18] sm:$0xff]  ;;  %v449_v22 = vld [vmem:[%s2157_s14 + $0x30] sm:$0xff] }
  0x92   : > { %473 = vmatpush.xpose.msra.mxu0 %v444_v19  ;;  %496 = vmatpush.xpose.msra.mxu1 %v446_v20  ;;  %v443_v23 = vld [vmem:[%s2157_s14] sm:$0xff]  ;;  %v445_v24 = vld [vmem:[%s2157_s14 + $0x10] sm:$0xff]  ;;  %v455_v25 = vld [vmem:[#allocation3 + $0x28] sm:$0xff] }
  0x93   : > { %v457_v26 = vld [vmem:[#allocation3 + $0x30] sm:$0xff]  ;;  %v451_v27 = vld [vmem:[#allocation3] sm:$0xff]  ;;  %v456_v29 = vld [vmem:[#allocation3 + $0x8] sm:$0xff] }
  0x94   : > { %v453_v28 = vld [vmem:[#allocation3 + $0x10] sm:$0xff]  ;;  %v458_v30 = vld [vmem:[#allocation3 + $0x38] sm:$0xff]  ;;  %v454_v32 = vld [vmem:[#allocation3 + $0x20] sm:$0xff] }
  0x95   : > { %520 = vmatpush.xpose.msra.mxu2 %v447_v21  ;;  %543 = vmatpush.xpose.msra.mxu3 %v449_v22  ;;  %v452_v31 = vld [vmem:[#allocation3 + $0x18] sm:$0xff] }
  0x96   : > { %474 = vmatpush.xpose.msra.mxu0 %v443_v23  ;;  %497 = vmatpush.xpose.msra.mxu1 %v445_v24 }
  0x98   : > { %521 = vmatmul.f32.vlgmr.msra.gmra.mxu2 %v455_v25  ;;  %544 = vmatmul.f32.vlgmr.msra.gmra.mxu3 %v457_v26 }
  0x99   : > { %700 = vmatpush.msrb.mxu2 %v448_v17  ;;  %729 = vmatpush.msrb.mxu3 %v450_v18 }
  0x9a   : > { %475 = vmatmul.f32.vlgmr.msra.gmra.mxu0 %v451_v27  ;;  %498 = vmatmul.f32.vlgmr.msra.gmra.mxu1 %v453_v28 }
  0x9b   : > { %642 = vmatpush.msrb.mxu0 %v444_v19  ;;  %671 = vmatpush.msrb.mxu1 %v446_v20 }
  0x9c   : > { %701 = vmatpush.msrb.mxu2 %v447_v21  ;;  %730 = vmatpush.msrb.mxu3 %v449_v22 }
  0x9d   : > { %643 = vmatpush.msrb.mxu0 %v443_v23  ;;  %672 = vmatpush.msrb.mxu1 %v445_v24 }
  0xa0   : > { %524 = vmatmul.f32.gmra.mxu2 %v456_v29  ;;  %547 = vmatmul.f32.gmra.mxu3 %v458_v30 }
  0xa2   : > { %478 = vmatmul.f32.gmra.mxu0 %v452_v31  ;;  %501 = vmatmul.f32.gmra.mxu1 %v454_v32 }
 0x117   : > { %v476_v33 = vpop.f32.mrf.mxu0  ;;  %v499_v34 = vpop.f32.mrf.mxu1 }
 0x118   : > { %v552_v35 = vsel %vm551_vm0, %v476_v33, -inf  ;;  %v553_v36 = vsel %vm551_vm0, %v499_v34, -inf }
 0x11b   : > { %v522_v37 = vpop.f32.mrf.mxu2  ;;  %v545_v38 = vpop.f32.mrf.mxu3 }
 0x11c   : > { %v554_v39 = vsel %vm551_vm0, %v522_v37, -inf  ;;  %v556_v40 = vsel %vm551_vm0, %v545_v38, -inf }
 0x11d   : > { %v555_v41 = vmax.f32 %v552_v35, %v554_v39  ;;  %v557_v42 = vmax.f32 %v553_v36, %v556_v40  ;;  %v614_v39 = vld [vmem:[#allocation2 + $0x30] sm:$0xff]  ;;  %v616_v40 = vld [vmem:[#allocation2 + $0x18] sm:$0xff] }
 0x11f   : > { %v558_v43 = vmax.f32 %v555_v41, %v557_v42  ;;  %v479_v44 = vpop.f32.mrf.mxu0  ;;  %v502_v45 = vpop.f32.mrf.mxu1 }
 0x120   : > { %v559_v50 = vsel %vm551_vm0, %v479_v44, -inf  ;;  %v560_v51 = vsel %vm551_vm0, %v502_v45, -inf }
 0x121   : > { %v566_v46 = vsub.f32 %v476_v33, %v558_v43  ;;  %v568_v47 = vsub.f32 %v499_v34, %v558_v43  ;;  %v570_v48 = vsub.f32 %v522_v37, %v558_v43  ;;  %v572_v49 = vsub.f32 %v545_v38, %v558_v43 }
 0x123   : > { %v574_v52 = vmul.f32 1.442695, %v566_v46  ;;  %v578_v53 = vmul.f32 1.442695, %v568_v47  ;;  %v582_v54 = vmul.f32 1.442695, %v570_v48  ;;  %v525_v55 = vpop.f32.mrf.mxu2  ;;  %v548_v56 = vpop.f32.mrf.mxu3 }
 0x124   : > { %v586_v57 = vmul.f32 1.442695, %v572_v49  ;;  %v561_v58 = vsel %vm551_vm0, %v525_v55, -inf  ;;  %v563_v59 = vsel %vm551_vm0, %v548_v56, -inf  ;;  %v620_v46 = vld [vmem:[#allocation2 + $0x28] sm:$0xff]  ;;  %v615_v47 = vld [vmem:[#allocation2] sm:$0xff] }
 0x125   : > { %1529 = vpow2.f32 %v574_v52  ;;  %v562_v60 = vmax.f32 %v559_v50, %v561_v58  ;;  %v564_v61 = vmax.f32 %v560_v51, %v563_v59  ;;  %v617_v48 = vld [vmem:[#allocation2 + $0x10] sm:$0xff]  ;;  %v621_v58 = vld [vmem:[#allocation2 + $0x38] sm:$0xff] }
 0x126   : > { %1531 = vpow2.f32 %v578_v53 }
 0x127   : > { %1533 = vpow2.f32 %v582_v54  ;;  %v565_v62 = vmax.f32 %v562_v60, %v564_v61 }
 0x128   : > { %1535 = vpow2.f32 %v586_v57  ;;  %v619_v57 = vld [vmem:[#allocation2 + $0x20] sm:$0xff] }
 0x129   : > { %v567_v63 = vsub.f32 %v479_v44, %v565_v62  ;;  %v569_v0 = vsub.f32 %v502_v45, %v565_v62  ;;  %v571_v1 = vsub.f32 %v525_v55, %v565_v62  ;;  %v573_v2 = vsub.f32 %v548_v56, %v565_v62  ;;  %v618_v45 = vld [vmem:[#allocation2 + $0x8] sm:$0xff] }
 0x12b   : > { %v1530_v3 = vpop.eup %1529  ;;  %v576_v4 = vmul.f32 1.442695, %v567_v63  ;;  %v580_v5 = vmul.f32 1.442695, %v569_v0  ;;  %v584_v6 = vmul.f32 1.442695, %v571_v1 }
 0x12c   : > { %v1532_v7 = vpop.eup %1531  ;;  %v590_v8 = vsel %vm551_vm0, %v1530_v3, 0.0  ;;  %v588_v9 = vmul.f32 1.442695, %v573_v2 }
 0x12d   : > { %v1534_v10 = vpop.eup %1533  ;;  %v591_v11 = vsel %vm551_vm0, %v1532_v7, 0.0  ;;  %1537 = vpow2.f32 %v576_v4 }
 0x12e   : > { %v1536_v12 = vpop.eup %1535  ;;  %v592_v13 = vadd.f32 %v591_v11, %v590_v8  ;;  %1539 = vpow2.f32 %v580_v5  ;;  %v593_v14 = vsel %vm551_vm0, %v1534_v10, 0.0 }
 0x12f   : > { %1541 = vpow2.f32 %v584_v6  ;;  %v595_v16 = vsel %vm551_vm0, %v1536_v12, 0.0 }
 0x130   : > { %v594_v15 = vadd.f32 %v593_v14, %v592_v13  ;;  %1543 = vpow2.f32 %v588_v9 }
 0x132   : > { %v596_v17 = vadd.f32 %v595_v16, %v594_v15 }
 0x133   : > { %v1538_v18 = vpop.eup %1537 }
 0x134   : > { %v1540_v19 = vpop.eup %1539  ;;  %1545 = vrcp.f32 %v596_v17  ;;  %v597_v20 = vsel %vm551_vm0, %v1538_v18, 0.0 }
 0x135   : > { %v1542_v21 = vpop.eup %1541  ;;  %v598_v22 = vsel %vm551_vm0, %v1540_v19, 0.0 }
 0x136   : > { %v1544_v23 = vpop.eup %1543  ;;  %v599_v24 = vadd.f32 %v598_v22, %v597_v20  ;;  %v600_v25 = vsel %vm551_vm0, %v1542_v21, 0.0 }
 0x137   : > { %v602_v27 = vsel %vm551_vm0, %v1544_v23, 0.0 }
 0x138   : > { %v601_v26 = vadd.f32 %v600_v25, %v599_v24 }
 0x13a   : > { %v1546_v28 = vpop.eup %1545  ;;  %v603_v29 = vadd.f32 %v602_v27, %v601_v26 }
 0x13b   : > { %v606_v30 = vmul.f32 %v1546_v28, %v1530_v3  ;;  %v608_v31 = vmul.f32 %v1546_v28, %v1532_v7  ;;  %v610_v32 = vmul.f32 %v1546_v28, %v1534_v10  ;;  %v612_v33 = vmul.f32 %v1546_v28, %v1536_v12 }
 0x13c   : > { %1547 = vrcp.f32 %v603_v29 }
 0x13d   : > { %1355 = vmatmul.msk.f32.vlgmr.msrb.gmra.mxu0 %vm551_vm0, %v606_v30  ;;  %1357 = vmatmul.msk.f32.vlgmr.msrb.gmra.mxu1 %vm551_vm0, %v608_v31 }
 0x13e   : > { %1359 = vmatmul.msk.f32.vlgmr.msrb.gmra.mxu2 %vm551_vm0, %v610_v32  ;;  %1361 = vmatmul.msk.f32.vlgmr.msrb.gmra.mxu3 %vm551_vm0, %v612_v33 }
 0x142   : > { %v1548_v34 = vpop.eup %1547 }
 0x143   : > { %v607_v35 = vmul.f32 %v1548_v34, %v1538_v18  ;;  %v609_v36 = vmul.f32 %v1548_v34, %v1540_v19  ;;  %v611_v37 = vmul.f32 %v1548_v34, %v1542_v21  ;;  %v613_v38 = vmul.f32 %v1548_v34, %v1544_v23 }
 0x145   : > { %1356 = vmatmul.msk.f32.gmra.mxu0 %vm551_vm0, %v607_v35  ;;  %1358 = vmatmul.msk.f32.gmra.mxu1 %vm551_vm0, %v609_v36 }
 0x146   : > { %1360 = vmatmul.msk.f32.gmra.mxu2 %vm551_vm0, %v611_v37  ;;  %1362 = vmatmul.msk.f32.gmra.mxu3 %vm551_vm0, %v613_v38 }
 0x1ba   : > { %v645_v41 = vpop.f32.mrf.mxu0  ;;  %v674_v42 = vpop.f32.mrf.mxu1 }
 0x1bb   : > { %v738_v43 = vadd.f32 %v645_v41, %v614_v39  ;;  %v740_v44 = vadd.f32 %v674_v42, %v616_v40 }
 0x1bd   : > { %746 = vst [vmem:[#allocation2 + $0x30] sm:$0xff] %v738_v43 }
 0x1be   : > { %748 = vst [vmem:[#allocation2 + $0x18] sm:$0xff] %v740_v44 }
 0x1c1   : > { %v703_v49 = vpop.f32.mrf.mxu2  ;;  %v732_v50 = vpop.f32.mrf.mxu3 }
 0x1c2   : > { %v742_v51 = vadd.f32 %v703_v49, %v618_v45  ;;  %v744_v52 = vadd.f32 %v732_v50, %v620_v46  ;;  %v648_v53 = vpop.f32.mrf.mxu0  ;;  %v677_v54 = vpop.f32.mrf.mxu1 }
 0x1c3   : > { %v739_v55 = vadd.f32 %v648_v53, %v615_v47  ;;  %v741_v56 = vadd.f32 %v677_v54, %v617_v48 }
 0x1c4   : > { %750 = vst [vmem:[#allocation2 + $0x8] sm:$0xff] %v742_v51 }
 0x1c5   : > { %752 = vst [vmem:[#allocation2 + $0x28] sm:$0xff] %v744_v52 }
 0x1c6   : > { %747 = vst [vmem:[#allocation2] sm:$0xff] %v739_v55 }
 0x1c7   : > { %749 = vst [vmem:[#allocation2 + $0x10] sm:$0xff] %v741_v56 }
 0x1c9   : > { %v706_v59 = vpop.f32.mrf.mxu2  ;;  %v735_v60 = vpop.f32.mrf.mxu3 }
 0x1ca   : > { %v743_v61 = vadd.f32 %v706_v59, %v619_v57  ;;  %v745_v62 = vadd.f32 %v735_v60, %v621_v58 }
 0x1cc   : > { %751 = vst [vmem:[#allocation2 + $0x20] sm:$0xff] %v743_v61 }
 0x1cd   : > { %753 = vst [vmem:[#allocation2 + $0x38] sm:$0xff] %v745_v62 }
 0x1ce PF: > { %p1363_p4 = scmp.ne.s32.totalorder %s1833_s24, 1 }
 0x1d0   : > { %757 = sbr.rel (%p1363_p4) target bundleno = 487 (0x1e7), region = 64 }
 0x1d5   : > { %v758_v63 = vld [vmem:[#allocation2 + $0x30] sm:$0xff]  ;;  %v759_v0 = vld [vmem:[#allocation2] sm:$0xff]  ;;  %v760_v1 = vld [vmem:[#allocation2 + $0x18] sm:$0xff]  ;;  %v1854_v8 = vmov 0.0  }
 0x1d6   : > { %v766_v2 = vmul.f32 0.088388346, %v758_v63  ;;  %v767_v3 = vmul.f32 0.088388346, %v759_v0  ;;  %v768_v4 = vmul.f32 0.088388346, %v760_v1 }
 0x1d7   : > { %v761_v5 = vld [vmem:[#allocation2 + $0x10] sm:$0xff]  ;;  %v762_v6 = vld [vmem:[#allocation2 + $0x8] sm:$0xff]  ;;  %v763_v7 = vld [vmem:[#allocation2 + $0x20] sm:$0xff]  ;;  %782 = vst [vmem:[#allocation2 + $0x30] sm:$0xff] %v1854_v8 }
 0x1d8   : > { %774 = vst [vmem:[#allocation3] sm:$0xff] %v766_v2  ;;  %v769_v9 = vmul.f32 0.088388346, %v761_v5  ;;  %v770_v10 = vmul.f32 0.088388346, %v762_v6  ;;  %v764_v11 = vld [vmem:[#allocation2 + $0x28] sm:$0xff] }
 0x1d9   : > { %775 = vst [vmem:[#allocation3 + $0x18] sm:$0xff] %v767_v3  ;;  %v771_v12 = vmul.f32 0.088388346, %v763_v7  ;;  %v765_v13 = vld [vmem:[#allocation2 + $0x38] sm:$0xff]  ;;  %v772_v14 = vmul.f32 0.088388346, %v764_v11 }
 0x1da   : > { %776 = vst [vmem:[#allocation3 + $0x10] sm:$0xff] %v768_v4  ;;  %v773_v15 = vmul.f32 0.088388346, %v765_v13 }
 0x1db   : > { %777 = vst [vmem:[#allocation3 + $0x20] sm:$0xff] %v769_v9 }
 0x1dc   : > { %778 = vst [vmem:[#allocation3 + $0x28] sm:$0xff] %v770_v10 }
 0x1dd   : > { %779 = vst [vmem:[#allocation3 + $0x8] sm:$0xff] %v771_v12 }
 0x1de   : > { %780 = vst [vmem:[#allocation3 + $0x30] sm:$0xff] %v772_v14 }
 0x1df   : > { %781 = vst [vmem:[#allocation3 + $0x38] sm:$0xff] %v773_v15 }
 0x1e0   : > { %783 = vst [vmem:[#allocation2] sm:$0xff] %v1854_v8 }
 0x1e1   : > { %784 = vst [vmem:[#allocation2 + $0x18] sm:$0xff] %v1854_v8 }
 0x1e2   : > { %785 = vst [vmem:[#allocation2 + $0x10] sm:$0xff] %v1854_v8 }
 0x1e3   : > { %786 = vst [vmem:[#allocation2 + $0x8] sm:$0xff] %v1854_v8 }
 0x1e4   : > { %787 = vst [vmem:[#allocation2 + $0x20] sm:$0xff] %v1854_v8 }
 0x1e5   : > { %788 = vst [vmem:[#allocation2 + $0x28] sm:$0xff] %v1854_v8 }
 0x1e6   : > { %789 = vst [vmem:[#allocation2 + $0x38] sm:$0xff] %v1854_v8 }
 0x1e7 PF: > { %p1364_p6 = scmp.lt.s32.totalorder %s1833_s24, 1 }
 0x1e9   : > { %793 = sbr.rel (%p1364_p6) target bundleno = 812 (0x32c), region = 68 }
 0x1ee   : > { %v799_v16 = vld [vmem:[%s2164_s23 + $0x28] sm:$0xff]  ;;  %v801_v17 = vld [vmem:[%s2164_s23 + $0x38] sm:$0xff]  ;;  %v798_v20 = vld [vmem:[%s2164_s23 + $0x20] sm:$0xff]  ;;  %vm902_vm1 = vcmask 130048  }
 0x1ef   : > { %870 = vmatpush.xpose.msra.mxu2 %v799_v16  ;;  %893 = vmatpush.xpose.msra.mxu3 %v801_v17  ;;  %v795_v18 = vld [vmem:[%s2164_s23 + $0x8] sm:$0xff]  ;;  %v797_v19 = vld [vmem:[%s2164_s23 + $0x18] sm:$0xff]  ;;  %v800_v21 = vld [vmem:[%s2164_s23 + $0x30] sm:$0xff] }
 0x1f0   : > { %824 = vmatpush.xpose.msra.mxu0 %v795_v18  ;;  %847 = vmatpush.xpose.msra.mxu1 %v797_v19  ;;  %v794_v22 = vld [vmem:[%s2164_s23] sm:$0xff]  ;;  %v796_v23 = vld [vmem:[%s2164_s23 + $0x10] sm:$0xff]  ;;  %v806_v24 = vld [vmem:[#allocation3 + $0x28] sm:$0xff] }
 0x1f1   : > { %v808_v25 = vld [vmem:[#allocation3 + $0x30] sm:$0xff]  ;;  %v802_v26 = vld [vmem:[#allocation3] sm:$0xff]  ;;  %v807_v28 = vld [vmem:[#allocation3 + $0x8] sm:$0xff] }
 0x1f2   : > { %v804_v27 = vld [vmem:[#allocation3 + $0x10] sm:$0xff]  ;;  %v809_v29 = vld [vmem:[#allocation3 + $0x38] sm:$0xff]  ;;  %v805_v31 = vld [vmem:[#allocation3 + $0x20] sm:$0xff] }
 0x1f3   : > { %871 = vmatpush.xpose.msra.mxu2 %v798_v20  ;;  %894 = vmatpush.xpose.msra.mxu3 %v800_v21  ;;  %v803_v30 = vld [vmem:[#allocation3 + $0x18] sm:$0xff] }
 0x1f4   : > { %825 = vmatpush.xpose.msra.mxu0 %v794_v22  ;;  %848 = vmatpush.xpose.msra.mxu1 %v796_v23 }
 0x1f6   : > { %872 = vmatmul.f32.vlgmr.msra.gmra.mxu2 %v806_v24  ;;  %895 = vmatmul.f32.vlgmr.msra.gmra.mxu3 %v808_v25 }
 0x1f7   : > { %1051 = vmatpush.msrb.mxu2 %v799_v16  ;;  %1080 = vmatpush.msrb.mxu3 %v801_v17 }
 0x1f8   : > { %826 = vmatmul.f32.vlgmr.msra.gmra.mxu0 %v802_v26  ;;  %849 = vmatmul.f32.vlgmr.msra.gmra.mxu1 %v804_v27 }
 0x1f9   : > { %993 = vmatpush.msrb.mxu0 %v795_v18  ;;  %1022 = vmatpush.msrb.mxu1 %v797_v19 }
 0x1fa   : > { %1052 = vmatpush.msrb.mxu2 %v798_v20  ;;  %1081 = vmatpush.msrb.mxu3 %v800_v21 }
 0x1fb   : > { %994 = vmatpush.msrb.mxu0 %v794_v22  ;;  %1023 = vmatpush.msrb.mxu1 %v796_v23 }
 0x1fe   : > { %875 = vmatmul.f32.gmra.mxu2 %v807_v28  ;;  %898 = vmatmul.f32.gmra.mxu3 %v809_v29 }
 0x200   : > { %829 = vmatmul.f32.gmra.mxu0 %v803_v30  ;;  %852 = vmatmul.f32.gmra.mxu1 %v805_v31 }
 0x275   : > { %v827_v32 = vpop.f32.mrf.mxu0  ;;  %v850_v33 = vpop.f32.mrf.mxu1 }
 0x276   : > { %v903_v34 = vsel %vm902_vm1, %v827_v32, -inf  ;;  %v904_v35 = vsel %vm902_vm1, %v850_v33, -inf }
 0x279   : > { %v873_v36 = vpop.f32.mrf.mxu2  ;;  %v896_v37 = vpop.f32.mrf.mxu3 }
 0x27a   : > { %v905_v38 = vsel %vm902_vm1, %v873_v36, -inf  ;;  %v907_v39 = vsel %vm902_vm1, %v896_v37, -inf }
 0x27b   : > { %v906_v40 = vmax.f32 %v903_v34, %v905_v38  ;;  %v908_v41 = vmax.f32 %v904_v35, %v907_v39  ;;  %v965_v38 = vld [vmem:[#allocation2 + $0x30] sm:$0xff]  ;;  %v967_v39 = vld [vmem:[#allocation2 + $0x18] sm:$0xff] }
 0x27d   : > { %v909_v42 = vmax.f32 %v906_v40, %v908_v41  ;;  %v830_v43 = vpop.f32.mrf.mxu0  ;;  %v853_v44 = vpop.f32.mrf.mxu1 }
 0x27e   : > { %v910_v49 = vsel %vm902_vm1, %v830_v43, -inf  ;;  %v911_v50 = vsel %vm902_vm1, %v853_v44, -inf }
 0x27f   : > { %v917_v45 = vsub.f32 %v827_v32, %v909_v42  ;;  %v919_v46 = vsub.f32 %v850_v33, %v909_v42  ;;  %v921_v47 = vsub.f32 %v873_v36, %v909_v42  ;;  %v923_v48 = vsub.f32 %v896_v37, %v909_v42 }
 0x281   : > { %v925_v51 = vmul.f32 1.442695, %v917_v45  ;;  %v929_v52 = vmul.f32 1.442695, %v919_v46  ;;  %v933_v53 = vmul.f32 1.442695, %v921_v47  ;;  %v876_v54 = vpop.f32.mrf.mxu2  ;;  %v899_v55 = vpop.f32.mrf.mxu3 }
 0x282   : > { %v937_v56 = vmul.f32 1.442695, %v923_v48  ;;  %v912_v57 = vsel %vm902_vm1, %v876_v54, -inf  ;;  %v914_v58 = vsel %vm902_vm1, %v899_v55, -inf  ;;  %v971_v45 = vld [vmem:[#allocation2 + $0x28] sm:$0xff]  ;;  %v966_v46 = vld [vmem:[#allocation2] sm:$0xff] }
 0x283   : > { %1549 = vpow2.f32 %v925_v51  ;;  %v913_v59 = vmax.f32 %v910_v49, %v912_v57  ;;  %v915_v60 = vmax.f32 %v911_v50, %v914_v58  ;;  %v968_v47 = vld [vmem:[#allocation2 + $0x10] sm:$0xff]  ;;  %v972_v57 = vld [vmem:[#allocation2 + $0x38] sm:$0xff] }
 0x284   : > { %1551 = vpow2.f32 %v929_v52 }
 0x285   : > { %1553 = vpow2.f32 %v933_v53  ;;  %v916_v61 = vmax.f32 %v913_v59, %v915_v60 }
 0x286   : > { %1555 = vpow2.f32 %v937_v56  ;;  %v970_v56 = vld [vmem:[#allocation2 + $0x20] sm:$0xff] }
 0x287   : > { %v918_v62 = vsub.f32 %v830_v43, %v916_v61  ;;  %v920_v63 = vsub.f32 %v853_v44, %v916_v61  ;;  %v922_v0 = vsub.f32 %v876_v54, %v916_v61  ;;  %v924_v1 = vsub.f32 %v899_v55, %v916_v61  ;;  %v969_v44 = vld [vmem:[#allocation2 + $0x8] sm:$0xff] }
 0x289   : > { %v1550_v2 = vpop.eup %1549  ;;  %v927_v3 = vmul.f32 1.442695, %v918_v62  ;;  %v931_v4 = vmul.f32 1.442695, %v920_v63  ;;  %v935_v5 = vmul.f32 1.442695, %v922_v0 }
 0x28a   : > { %v1552_v6 = vpop.eup %1551  ;;  %v941_v7 = vsel %vm902_vm1, %v1550_v2, 0.0  ;;  %v939_v8 = vmul.f32 1.442695, %v924_v1 }
 0x28b   : > { %v1554_v9 = vpop.eup %1553  ;;  %v942_v10 = vsel %vm902_vm1, %v1552_v6, 0.0  ;;  %1557 = vpow2.f32 %v927_v3 }
 0x28c   : > { %v1556_v11 = vpop.eup %1555  ;;  %v943_v12 = vadd.f32 %v942_v10, %v941_v7  ;;  %1559 = vpow2.f32 %v931_v4  ;;  %v944_v13 = vsel %vm902_vm1, %v1554_v9, 0.0 }
 0x28d   : > { %1561 = vpow2.f32 %v935_v5  ;;  %v946_v15 = vsel %vm902_vm1, %v1556_v11, 0.0 }
 0x28e   : > { %v945_v14 = vadd.f32 %v944_v13, %v943_v12  ;;  %1563 = vpow2.f32 %v939_v8 }
 0x290   : > { %v947_v16 = vadd.f32 %v946_v15, %v945_v14 }
 0x291   : > { %v1558_v17 = vpop.eup %1557 }
 0x292   : > { %v1560_v18 = vpop.eup %1559  ;;  %1565 = vrcp.f32 %v947_v16  ;;  %v948_v19 = vsel %vm902_vm1, %v1558_v17, 0.0 }
 0x293   : > { %v1562_v20 = vpop.eup %1561  ;;  %v949_v21 = vsel %vm902_vm1, %v1560_v18, 0.0 }
 0x294   : > { %v1564_v22 = vpop.eup %1563  ;;  %v950_v23 = vadd.f32 %v949_v21, %v948_v19  ;;  %v951_v24 = vsel %vm902_vm1, %v1562_v20, 0.0 }
 0x295   : > { %v953_v26 = vsel %vm902_vm1, %v1564_v22, 0.0 }
 0x296   : > { %v952_v25 = vadd.f32 %v951_v24, %v950_v23 }
 0x298   : > { %v1566_v27 = vpop.eup %1565  ;;  %v954_v28 = vadd.f32 %v953_v26, %v952_v25 }
 0x299   : > { %v957_v29 = vmul.f32 %v1566_v27, %v1550_v2  ;;  %v959_v30 = vmul.f32 %v1566_v27, %v1552_v6  ;;  %v961_v31 = vmul.f32 %v1566_v27, %v1554_v9  ;;  %v963_v32 = vmul.f32 %v1566_v27, %v1556_v11 }
 0x29a   : > { %1567 = vrcp.f32 %v954_v28 }
 0x29b   : > { %1365 = vmatmul.msk.f32.vlgmr.msrb.gmra.mxu0 %vm902_vm1, %v957_v29  ;;  %1367 = vmatmul.msk.f32.vlgmr.msrb.gmra.mxu1 %vm902_vm1, %v959_v30 }
 0x29c   : > { %1369 = vmatmul.msk.f32.vlgmr.msrb.gmra.mxu2 %vm902_vm1, %v961_v31  ;;  %1371 = vmatmul.msk.f32.vlgmr.msrb.gmra.mxu3 %vm902_vm1, %v963_v32 }
 0x2a0   : > { %v1568_v33 = vpop.eup %1567 }
 0x2a1   : > { %v958_v34 = vmul.f32 %v1568_v33, %v1558_v17  ;;  %v960_v35 = vmul.f32 %v1568_v33, %v1560_v18  ;;  %v962_v36 = vmul.f32 %v1568_v33, %v1562_v20  ;;  %v964_v37 = vmul.f32 %v1568_v33, %v1564_v22 }
 0x2a3   : > { %1366 = vmatmul.msk.f32.gmra.mxu0 %vm902_vm1, %v958_v34  ;;  %1368 = vmatmul.msk.f32.gmra.mxu1 %vm902_vm1, %v960_v35 }
 0x2a4   : > { %1370 = vmatmul.msk.f32.gmra.mxu2 %vm902_vm1, %v962_v36  ;;  %1372 = vmatmul.msk.f32.gmra.mxu3 %vm902_vm1, %v964_v37 }
 0x318   : > { %v996_v40 = vpop.f32.mrf.mxu0  ;;  %v1025_v41 = vpop.f32.mrf.mxu1 }
 0x319   : > { %v1089_v42 = vadd.f32 %v996_v40, %v965_v38  ;;  %v1091_v43 = vadd.f32 %v1025_v41, %v967_v39 }
 0x31b   : > { %1097 = vst [vmem:[#allocation2 + $0x30] sm:$0xff] %v1089_v42 }
 0x31c   : > { %1099 = vst [vmem:[#allocation2 + $0x18] sm:$0xff] %v1091_v43 }
 0x31f   : > { %v1054_v48 = vpop.f32.mrf.mxu2  ;;  %v1083_v49 = vpop.f32.mrf.mxu3 }
 0x320   : > { %v1093_v50 = vadd.f32 %v1054_v48, %v969_v44  ;;  %v1095_v51 = vadd.f32 %v1083_v49, %v971_v45  ;;  %v999_v52 = vpop.f32.mrf.mxu0  ;;  %v1028_v53 = vpop.f32.mrf.mxu1 }
 0x321   : > { %v1090_v54 = vadd.f32 %v999_v52, %v966_v46  ;;  %v1092_v55 = vadd.f32 %v1028_v53, %v968_v47 }
 0x322   : > { %1101 = vst [vmem:[#allocation2 + $0x8] sm:$0xff] %v1093_v50 }
 0x323   : > { %1103 = vst [vmem:[#allocation2 + $0x28] sm:$0xff] %v1095_v51 }
 0x324   : > { %1098 = vst [vmem:[#allocation2] sm:$0xff] %v1090_v54 }
 0x325   : > { %1100 = vst [vmem:[#allocation2 + $0x10] sm:$0xff] %v1092_v55 }
 0x327   : > { %v1057_v58 = vpop.f32.mrf.mxu2  ;;  %v1086_v59 = vpop.f32.mrf.mxu3 }
 0x328   : > { %v1094_v60 = vadd.f32 %v1057_v58, %v970_v56  ;;  %v1096_v61 = vadd.f32 %v1086_v59, %v972_v57 }
 0x32a   : > { %1102 = vst [vmem:[#allocation2 + $0x20] sm:$0xff] %v1094_v60 }
 0x32b   : > { %1104 = vst [vmem:[#allocation2 + $0x38] sm:$0xff] %v1096_v61 }
 0x32c PF: > { %1107 = sbr.rel (%p1363_p4) target bundleno = 828 (0x33c), region = 72 }
 0x331   : > { %v1108_v62 = vld [vmem:[#allocation2 + $0x30] sm:$0xff]  ;;  %v1116_v63 = vld [vmem:[%s2171_s15] sm:$0xff]  ;;  %v1117_v2 = vld [vmem:[%s2171_s15 + $0x8] sm:$0xff] }
 0x332   : > { %v1109_v0 = vld [vmem:[#allocation2] sm:$0xff]  ;;  %v1124_v1 = vadd.f32 %v1116_v63, %v1108_v62  ;;  %v1110_v3 = vld [vmem:[#allocation2 + $0x18] sm:$0xff]  ;;  %v1118_v4 = vld [vmem:[%s2171_s15 + $0x10] sm:$0xff] }
 0x333   : > { %v1125_v5 = vadd.f32 %v1117_v2, %v1109_v0  ;;  %v1126_v6 = vadd.f32 %v1118_v4, %v1110_v3  ;;  %v1111_v7 = vld [vmem:[#allocation2 + $0x10] sm:$0xff]  ;;  %v1119_v8 = vld [vmem:[%s2171_s15 + $0x18] sm:$0xff]  ;;  %v1112_v9 = vld [vmem:[#allocation2 + $0x8] sm:$0xff] }
 0x334   : > { %1132 = vst [vmem:[%s2177_s11] sm:$0xff] %v1124_v1  ;;  %v1127_v10 = vadd.f32 %v1119_v8, %v1111_v7  ;;  %v1120_v11 = vld [vmem:[%s2171_s15 + $0x20] sm:$0xff]  ;;  %v1121_v13 = vld [vmem:[%s2171_s15 + $0x28] sm:$0xff]  ;;  %v1122_v17 = vld [vmem:[%s2171_s15 + $0x30] sm:$0xff] }
 0x335   : > { %v1113_v12 = vld [vmem:[#allocation2 + $0x20] sm:$0xff]  ;;  %1133 = vst [vmem:[%s2177_s11 + $0x8] sm:$0xff] %v1125_v5  ;;  %v1128_v14 = vadd.f32 %v1120_v11, %v1112_v9  ;;  %v1114_v16 = vld [vmem:[#allocation2 + $0x28] sm:$0xff]  ;;  %v1115_v18 = vld [vmem:[#allocation2 + $0x38] sm:$0xff] }
 0x336   : > { %v1129_v15 = vadd.f32 %v1121_v13, %v1113_v12  ;;  %1134 = vst [vmem:[%s2177_s11 + $0x10] sm:$0xff] %v1126_v6  ;;  %v1130_v19 = vadd.f32 %v1122_v17, %v1114_v16  ;;  %v1123_v20 = vld [vmem:[%s2171_s15 + $0x38] sm:$0xff] }
 0x337   : > { %1135 = vst [vmem:[%s2177_s11 + $0x18] sm:$0xff] %v1127_v10  ;;  %v1131_v21 = vadd.f32 %v1123_v20, %v1115_v18 }
 0x338   : > { %1136 = vst [vmem:[%s2177_s11 + $0x20] sm:$0xff] %v1128_v14 }
 0x339   : > { %1137 = vst [vmem:[%s2177_s11 + $0x28] sm:$0xff] %v1129_v15 }
 0x33a   : > { %1138 = vst [vmem:[%s2177_s11 + $0x30] sm:$0xff] %v1130_v19 }
 0x33b   : > { %1139 = vst [vmem:[%s2177_s11 + $0x38] sm:$0xff] %v1131_v21 }
 0x33c PF: > { %s2398_s24 = sld [smem:[#allocation21_spill]]  ;;  %s1155_s0 = sshll.u32 %s2177_s11, 4  ;;  %s1156_s0 = int_to_ptr.vmem [resolvable:$true] %s1155_s0 }
 0x33d   : > { %s2399_s25 = sld [smem:[#allocation28_spill]]  ;;  %s1141_s18 = scalar_lea.sflag [#allocation6], %s2145_s13 }
 0x33e   : > { %s2400_s21 = sld [smem:[#allocation33_spill]] }
 0x342   : > { %s1381_s6 = sshll.u32 %s2398_s24, 6 }
 0x343   : > { %p2402_p12 = scmp.ne.s32.totalorder %s2399_s25, 0 }
 0x344   : > { %s2401_s5 = smov %s2400_s21  ;;  %s1154_s26 = scalar_lea.hbm %s2400_s21, %s1381_s6 }
 0x345   : > { %s1157_s7 = sshll.u32 %s1154_s26, 4  ;;  %s1709_s9 = scalar_lea.hbm %s2401_s5, 128  ;;  %s1158_s7 = int_to_ptr.hbm [resolvable:$true] %s1157_s7 }
 0x346   : > { %s1703_s8 = sshra.s32 %s1158_s7, 4  ;;  %s1704_s8 = int_to_ptr.hbm [resolvable:$true] %s1703_s8 }
 0x347   : > { %s1705_s20 = scalar_lea.hbm %s1704_s8, 64  ;;  %p1710_p1 = scmp.lt.s32.totalorder %s1704_s8, %s2401_s5 }
 0x348   : > { %p1706_p7 = scmp.ne.s32.totalorder %s1704_s8, %s1705_s20  ;;  %p1711_p2 = scmp.lt.s32.totalorder %s1709_s9, %s1705_s20 }
 0x34a   : > { %p1707_p3 = pnand %p1706_p7, %p2402_p12  ;;  %p1712_p13 = por %p1711_p2, %p1710_p1 }
 0x34c   : > { %p1708_p5 = pneg %p1707_p3 }
 0x34e   : > { %p1713_p0 = pnand %p1712_p13, %p1708_p5 }
 0x350   : > { %1716 = shalt.err (!%p1713_p0)
}
 0x351   : > { %s1855_s13 = smov 128   ;;  %s1856_s30 = smov 8  }
 0x352   : > { %1390 = dma.vmem_to_hbm [thread:$0]  (%p2402_p12), %s1156_s0, 1024, %s1158_s7, %s1141_s18, %s1855_s13, %s1855_s13, %s1856_s30  }
 0x353 PF: > { %s2403_s23 = sld [smem:[#allocation19_spill]]  ;;  %p1410_p9 = scmp.ge.s32.totalorder %s1849_s28, 2 }
 0x354   : > { %s2404_s29 = sld [smem:[#allocation29_spill]] }
 0x359   : > { %s1172_s15 = sand.u32 1, %s2403_s23  }
 0x35a   : > { %p2405_p10 = scmp.ne.s32.totalorder %s2404_s29, 0  ;;  %s1173_s11 = scalar_lea.sflag [#allocation6], %s1172_s15 }
 0x35c   : > { %p1406_p8 = pnand %p1410_p9, %p2405_p10 }
 0x35e   : > { %p1407_p11 = pneg %p1406_p8 }
 0x360   : > { %1790 = dma.done.wait (%p1407_p11), %s1173_s11, 1024  }
 0x361   : > { %1792 = vsyncadd (%p1407_p11), %s1173_s11, 4294966272  ;;  %s26_s28 = sadd.s32 1, %s1849_s28   ;;  %s2407_s25 = sld [smem:[#allocation30_spill]] }
 0x362   : > { %p2296_p4 = scmp.ge.s32.totalorder %s26_s28, 6   ;;  %s2408_s6 = sld [smem:[#allocation18_spill]] }
 0x363   : > { %s2409_s20 = sld [smem:[#allocation26_spill]]  ;;  %s2417_s15 = smov %s1801_s16 }
 0x364   : > { %s2410_s1 = sld [smem:[#allocation20_spill]]  ;;  %s2418_s16 = smov %s1805_s17 }
 0x365   : > { %s2411_s23 = sld [smem:[#allocation27_spill]]  ;;  %s2420_s18 = smov %s1813_s19 }
 0x366   : > { %s2412_s10 = sld [smem:[#allocation22_spill]]  ;;  %s2422_s21 = smov %s1825_s22 }
 0x367   : > { %s2413_s26 = sld [smem:[#allocation23_spill]]  ;;  %s2419_s17 = smov %s2407_s25 }
 0x368   : > { %s2414_s0 = sld [smem:[#allocation24_spill]]  ;;  %s2421_s19 = smov %s2408_s6 }
 0x369   : > { %s2415_s27 = sld [smem:[#allocation25_spill]] }
 0x36a   : > { %s2423_s22 = smov %s2410_s1  ;;  %25 = sbr.rel (!%p2296_p4) target bundleno = 18 (0x12), region = 138 }
 0x36c   : > { %s2424_s24 = smov %s2412_s10 }
 0x36d   : > { %s2425_s25 = smov %s2413_s26 }
 0x36e   : > { %s2426_s26 = smov %s2414_s0 }
 0x36f   :  { %1179 = vsyncpa [#allocation5], 1 }
 0x370   :  { %1181 = vsyncpa [#allocation5 + $0x1], 1 }
 0x371   :  { %1182 = vsyncpa [#allocation8], 1 }
 0x372   :  { %1184 = vsyncpa [#allocation8 + $0x1], 1 }
 0x373   :  { %1185 = vsyncpa [#allocation11], 1 }
 0x374   :  { %1187 = vsyncpa [#allocation11 + $0x1], 1 }
 0x375   :  { %1188 = vsyncpa [#allocation6], 1 }
 0x376   :  { %1190 = vsyncpa [#allocation6 + $0x1], 1 }

</bundles_post_ra>
